<compile_context>
chip_gen: v6e
topology: v6e:2x2x1
jax: 0.10.0
libtpu: 0.0.40
codegen_flags: <defaults>
</compile_context>

<pallas_src>
import jax
import jax.numpy as jnp
from jax.experimental import pallas as pl
from jax.experimental.pallas import tpu as pltpu

_LANES = 128           # vreg lane width; last block dim must be 128-aligned
_MAX_TILE_ROWS = 4096  # (4096, 128) f32 = 2 MiB per tile buffer


def _linreg_kernel(w_ref, b_ref, x_ref, o_ref):
    # w_ref, b_ref: (1, 1) f32 scalars in SMEM
    # x_ref, o_ref: (tile_rows, 128) lane-dense tiles in VMEM
    w = w_ref[0, 0]
    b = b_ref[0, 0]
    # Pure VPU fused scale + bias (promote to f32 in-register, cast back).
    o_ref[...] = (x_ref[...] * w + b).astype(o_ref.dtype)


def _run_slab(x_slab, w, b):
    """Run the scale+bias kernel over a lane-dense (rows, 128) slab."""
    rows, lanes = x_slab.shape
    # Single full block when small (block == full array dims is always legal);
    # otherwise an (8,128)-aligned 4096-row tile with a masked partial tail.
    tile_rows = min(_MAX_TILE_ROWS, rows)
    grid = (pl.cdiv(rows, tile_rows),)
    itemsize = jnp.dtype(x_slab.dtype).itemsize

    return pl.pallas_call(
        _linreg_kernel,
        out_shape=jax.ShapeDtypeStruct((rows, lanes), x_slab.dtype),
        grid_spec=pl.GridSpec(
            grid=grid,
            in_specs=[
                pl.BlockSpec((1, 1), lambda i: (0, 0),
                             memory_space=pltpu.SMEM),               # weight scalar
                pl.BlockSpec((1, 1), lambda i: (0, 0),
                             memory_space=pltpu.SMEM),               # bias scalar
                pl.BlockSpec((tile_rows, lanes), lambda i: (i, 0)),  # x tile
            ],
            out_specs=pl.BlockSpec((tile_rows, lanes), lambda i: (i, 0)),
        ),
        compiler_params=pltpu.CompilerParams(
            dimension_semantics=("parallel",),
        ),
        cost_estimate=pl.CostEstimate(
            flops=2 * rows * lanes,
            bytes_accessed=2 * rows * lanes * itemsize,
            transcendentals=0,
        ),
    )(w, b, x_slab)


def linear_regression_forward(x, weight, bias):
    """y = x @ weight.T + bias for nn.Linear(1, 1): x (N,1) -> (N,1)."""
    n, f = x.shape
    assert f == 1, "linearRegression expects a single input feature"
    w = jnp.asarray(weight, jnp.float32).reshape(1, 1)
    b = jnp.asarray(bias, jnp.float32).reshape(1, 1)

    n_main = (n // _LANES) * _LANES

    y_main = None
    if n_main > 0:
        rows = n_main // _LANES
        if n_main == n:
            # Fast path: free bitcast, no pad, no slice, no extra HBM copies.
            x_slab = x.reshape(rows, _LANES)
        else:
            x_slab = x.reshape(-1)[:n_main].reshape(rows, _LANES)
        y_slab = _run_slab(x_slab, w, b)
        y_main = y_slab.reshape(n_main, 1)
        if n_main == n:
            return y_main  # free reshape back to (N, 1)

    # Ragged tail (< 128 elements): tiny jnp epilogue instead of padding /
    # copying the whole array.
    tail = x.reshape(-1)[n_main:].reshape(-1, 1)
    y_tail = (tail.astype(jnp.float32) * w[0, 0] + b[0, 0]).astype(x.dtype)
    if y_main is None:
        return y_tail
    return jnp.concatenate([y_main, y_tail], axis=0)


if __name__ == "__main__":
    # Deterministic parameters (shapes from nn.Linear(1, 1)).
    weight = jnp.array([[0.5]], dtype=jnp.float32)   # (out=1, in=1)
    bias = jnp.array([-0.25], dtype=jnp.float32)     # (1,)

    key = jax.random.PRNGKey(0)

    # Lane-aligned batch (N % 128 == 0): exercises the pure-kernel fast path.
    x = jax.random.normal(key, (256, 1), dtype=jnp.float32)
    out = jax.block_until_ready(linear_regression_forward(x, weight, bias))
    ref = x @ weight.T + bias
    assert out.shape == (256, 1)
    assert jnp.allclose(out, ref, atol=1e-6), "mismatch vs reference (aligned)"

    # Ragged batch: kernel on the first 128 rows + tiny jnp tail epilogue.
    x2 = jax.random.normal(jax.random.PRNGKey(1), (200, 1), dtype=jnp.float32)
    out2 = jax.block_until_ready(linear_regression_forward(x2, weight, bias))
    ref2 = x2 @ weight.T + bias
    assert out2.shape == (200, 1)
    assert jnp.allclose(out2, ref2, atol=1e-6), "mismatch vs reference (ragged)"

    print("KERNEL_OK")
</pallas_src>

<mosaic_0001>
module attributes {stable_mosaic.version = 11 : i64} {
  func.func @_linreg_kernel(%arg0: i32, %arg1: memref<1x1xf32, #tpu.memory_space<smem>>, %arg2: memref<1x1xf32, #tpu.memory_space<smem>>, %arg3: memref<2x128xf32, #tpu.memory_space<vmem>>, %arg4: memref<2x128xf32, #tpu.memory_space<vmem>>) attributes {dimension_semantics = [#tpu.dimension_semantics<parallel>], iteration_bounds = array<i64: 1>, scalar_prefetch = 0 : i64, scratch_operands = 0 : i64, tpu.core_type = #tpu.core_type<tc>, window_params = [{transform_indices = @transform_0, window_bounds = array<i64: 1, 1>}, {transform_indices = @transform_1, window_bounds = array<i64: 1, 1>}, {transform_indices = @transform_2, window_bounds = array<i64: 2, 128>}, {transform_indices = @transform_3, window_bounds = array<i64: 2, 128>}]} {
    %c0 = arith.constant 0 : index
    %c0_0 = arith.constant 0 : index
    %0 = memref.load %arg1[%c0, %c0_0] : memref<1x1xf32, #tpu.memory_space<smem>>
    %c0_1 = arith.constant 0 : index
    %c0_2 = arith.constant 0 : index
    %1 = memref.load %arg2[%c0_1, %c0_2] : memref<1x1xf32, #tpu.memory_space<smem>>
    %c0_3 = arith.constant 0 : index
    %c0_4 = arith.constant 0 : index
    %2 = vector.load %arg3[%c0_3, %c0_4] : memref<2x128xf32, #tpu.memory_space<vmem>>, vector<2x128xf32>
    %3 = vector.broadcast %0 : f32 to vector<2x128xf32>
    %4 = arith.mulf %2, %3 : vector<2x128xf32>
    %5 = vector.broadcast %1 : f32 to vector<2x128xf32>
    %6 = arith.addf %4, %5 : vector<2x128xf32>
    %c0_5 = arith.constant 0 : index
    %c0_6 = arith.constant 0 : index
    %7 = vector.load %arg4[%c0_5, %c0_6] : memref<2x128xf32, #tpu.memory_space<vmem>>, vector<2x128xf32>
    tpu.vector_store %arg4[%c0_5, %c0_6], %6 {strides = array<i32>} : memref<2x128xf32, #tpu.memory_space<vmem>>, vector<2x128xf32>,
    return
  }
  func.func @transform_0(%arg0: i32) -> (i32, i32) {
    %c0_i32 = arith.constant 0 : i32
    %c0_i32_0 = arith.constant 0 : i32
    %c0_i32_1 = arith.constant 0 : i32
    return %c0_i32, %c0_i32_0 : i32, i32
  }
  func.func @transform_1(%arg0: i32) -> (i32, i32) {
    %c0_i32 = arith.constant 0 : i32
    %c0_i32_0 = arith.constant 0 : i32
    %c0_i32_1 = arith.constant 0 : i32
    return %c0_i32, %c0_i32_0 : i32, i32
  }
  func.func @transform_2(%arg0: i32) -> (i32, i32) {
    %c0_i32 = arith.constant 0 : i32
    %c0_i32_0 = arith.constant 0 : i32
    return %arg0, %c0_i32 : i32, i32
  }
  func.func @transform_3(%arg0: i32) -> (i32, i32) {
    %c0_i32 = arith.constant 0 : i32
    %c0_i32_0 = arith.constant 0 : i32
    return %arg0, %c0_i32 : i32, i32
  }
}

</mosaic_0001>

<bundles_post_ra>
// kernel: tpu_custom_call.1
= control target key start
LH: loop header
LB: loop body
LE: loop exit
PB: predicated region body
PF: predicated region fallthrough
CT: control target
= control target key end

     0   :  { %s95_s0 = inlined_call_operand.<no memory space> [shape: f32[1,1], index: 0, kind: input, shape index: {}]   ;;  %s96_s1 = inlined_call_operand.<no memory space> [shape: f32[1,1], index: 1, kind: input, shape index: {}]   ;;  %s97_s2 = inlined_call_operand.vmem [shape: f32[2,128], index: 2, kind: input, shape index: {}]   ;;  %s98_s3 = inlined_call_operand.hbm [shape: f32[2,128], index: 3, kind: output, shape index: {}]  }
   0x1   :  { %v19_v0 = vld [vmem:[%s97_s2] sm:$0x3]  ;;  %v20_v1 = vstv %s95_s0  ;;  %v22_v2 = vstv %s96_s1 }
   0x2   :  { %10 = vsyncpa [#allocation5], 0  ;;  %v21_v3 = vmul.f32 %v20_v1, %v19_v0  ;;  %s62_s18 = smov [#allocation4]  }
   0x3   :  { %s31_s19 = sshll.u32 %s62_s18, 4  ;;  %s32_s19 = int_to_ptr.vmem [resolvable:$true] %s31_s19 }
   0x4   :  { %v23_v4 = vadd.f32 %v22_v2, %v21_v3  ;;  %s40_s20 = scalar_lea.vmem %s32_s19, 32  ;;  %p45_p1 = scmp.lt.s32.totalorder %s32_s19, %s32_s19 }
   0x5   :  { %p41_p0 = scmp.ne.s32.totalorder %s32_s19, %s40_s20  ;;  %p46_p2 = scmp.lt.s32.totalorder %s40_s20, %s40_s20 }
   0x6   :  { %24 = vst [vmem:[#allocation4] sm:$0x3] %v23_v4 }
   0x7   :  { %p47_p3 = por %p46_p2, %p45_p1 }
   0x9   :  { %p48_p4 = pnand %p47_p3, %p41_p0 }
   0xb   :  { %51 = shalt.err (!%p48_p4)
}
   0xc   :  { %34 = dma.vmem_to_hbm [thread:$0]  %s32_s19, 32, %s98_s3, [#allocation5]  }
   0xd   :  { %60 = dma.done.wait [#allocation5], 32  }
   0xe   :  { %61 = vsyncadd [#allocation5], 4294967264 }
   0xf   :  { %38 = vsyncpa [#allocation5], 1 }

</bundles_post_ra>
